<compile_context>
chip_gen: v6e
topology: v6e:2x2x1
jax: 0.10.0
libtpu: 0.0.40
codegen_flags: <defaults>
</compile_context>

<pallas_src>
import functools

import jax
import jax.numpy as jnp
from jax.experimental import pallas as pl
from jax.experimental.pallas import tpu as pltpu

LANE = 128          # lane width: last-dim padding target
BF16_SUBLANE = 16   # bf16 packs 16 rows per vreg -> minimum batch tile


def _round_up(n, m):
    return ((n + m - 1) // m) * m


def _vmem_capacity_bytes():
    """Physical VMEM of the current chip (fallback: v7x's 64 MiB per TC)."""
    try:
        return int(pltpu.get_tpu_info().vmem_capacity_bytes)
    except Exception:
        return 64 * 1024 * 1024


# ----------------------------------------------------------------------------
# Kernels
# ----------------------------------------------------------------------------
def _mlp_resident_kernel(*refs, num_layers: int):
    """All (W, b) resident in VMEM; running activation stays on-chip."""
    x_ref, o_ref = refs[0], refs[-1]
    wb = refs[1:-1]
    h = x_ref[...]                            # already bf16 (cast in wrapper)
    for i in range(num_layers):
        w_ref, b_ref = wb[2 * i], wb[2 * i + 1]
        # bf16 x bf16 -> f32 accumulate on the MXU.
        y = jnp.dot(h, w_ref[...], preferred_element_type=jnp.float32)
        y = y + b_ref[...]                    # f32 epilogue (v5e: no bf16 VPU)
        if i < num_layers - 1:
            h = jnp.maximum(y, 0.0).astype(jnp.bfloat16)
        else:
            h = y
    o_ref[...] = h.astype(o_ref.dtype)        # bf16 store: halves write bytes


def _mlp_stream_kernel(x_ref, w_ref, b_ref, o_ref, h_ref, *, num_layers: int):
    """Weight-streaming variant for configs whose weights don't fit VMEM.

    grid = (batch_tiles, layers).  One (padded) layer weight tile is resident
    at a time and the BlockSpec pipeline double-buffers the *next* layer's
    weight behind the current matmul.  The running activation lives in a VMEM
    scratch that persists across the layer axis.
    """
    l = pl.program_id(1)

    @pl.when(l == 0)
    def _():
        h_ref[...] = x_ref[...]

    y = jnp.dot(h_ref[...], w_ref[0], preferred_element_type=jnp.float32)
    y = y + b_ref[0]

    @pl.when(l < num_layers - 1)
    def _():
        h_ref[...] = jnp.maximum(y, 0.0).astype(h_ref.dtype)

    @pl.when(l == num_layers - 1)
    def _():
        o_ref[...] = y.astype(o_ref.dtype)


# ----------------------------------------------------------------------------
# Parameter construction (matches torch: xavier_uniform_ weights, zero bias)
# ----------------------------------------------------------------------------
def xavier_uniform(key, in_size, out_size, dtype=jnp.float32):
    # torch.nn.init.xavier_uniform_ (gain=1): U(-a, a), a = sqrt(6/(fan_in+fan_out))
    a = jnp.sqrt(6.0 / (in_size + out_size))
    # Stored already transposed to (in, out) for the kernel.
    return jax.random.uniform(key, (in_size, out_size), dtype, minval=-a, maxval=a)


def init_mlp_params(key, input_size, hidden_units, output_size):
    sizes = [input_size] + list(hidden_units) + [output_size]
    params = []
    for i in range(len(sizes) - 1):
        key, wk = jax.random.split(key)
        w = xavier_uniform(wk, sizes[i], sizes[i + 1])
        b = jnp.zeros((sizes[i + 1],), jnp.float32)
        params.append((w, b))
    return params


# ----------------------------------------------------------------------------
# pallas_call builders
# ----------------------------------------------------------------------------
def _resident_call(params, x, B, In, tm, B_pad, sizes_p, out_dtype,
                   vmem_limit, cost, *, single_buffer_weights):
    num_layers = len(params)
    In_pad, Out_pad = sizes_p[0], sizes_p[-1]
    xp = jnp.zeros((B_pad, In_pad), jnp.bfloat16).at[:B, :In].set(
        x.astype(jnp.bfloat16))

    flat = []
    in_specs = [pl.BlockSpec((tm, In_pad), lambda i: (i, 0))]
    for (w, b), kp, np_ in zip(params, sizes_p[:-1], sizes_p[1:]):
        K, N = w.shape
        flat.append(jnp.zeros((kp, np_), jnp.bfloat16).at[:K, :N].set(
            w.astype(jnp.bfloat16)))
        flat.append(jnp.zeros((1, np_), jnp.float32).at[:, :N].set(
            b.reshape(1, N)))
        if single_buffer_weights:
            # Constant index_map => grid-resident; Buffered(1) avoids a
            # useless second VMEM copy of every weight/bias.
            in_specs.append(pl.BlockSpec((kp, np_), lambda i: (0, 0),
                                         pipeline_mode=pl.Buffered(1)))
            in_specs.append(pl.BlockSpec((1, np_), lambda i: (0, 0),
                                         pipeline_mode=pl.Buffered(1)))
        else:
            in_specs.append(pl.BlockSpec((kp, np_), lambda i: (0, 0)))
            in_specs.append(pl.BlockSpec((1, np_), lambda i: (0, 0)))

    kernel = functools.partial(_mlp_resident_kernel, num_layers=num_layers)
    return pl.pallas_call(
        kernel,
        out_shape=jax.ShapeDtypeStruct((B_pad, Out_pad), out_dtype),
        grid=(B_pad // tm,),
        in_specs=in_specs,
        out_specs=pl.BlockSpec((tm, Out_pad), lambda i: (i, 0)),
        compiler_params=pltpu.CompilerParams(
            dimension_semantics=("parallel",),
            vmem_limit_bytes=vmem_limit),
        cost_estimate=cost,
    )(xp, *flat)


def _stream_call(params, x, B, In, tm, B_pad, Dmax, out_dtype, vmem_limit, cost):
    num_layers = len(params)
    xp = jnp.zeros((B_pad, Dmax), jnp.bfloat16).at[:B, :In].set(
        x.astype(jnp.bfloat16))
    # Stack all layers into uniform (padded) tiles for layer-axis streaming.
    W = jnp.zeros((num_layers, Dmax, Dmax), jnp.bfloat16)
    Bst = jnp.zeros((num_layers, 1, Dmax), jnp.float32)
    for l, (w, b) in enumerate(params):
        K, N = w.shape
        W = W.at[l, :K, :N].set(w.astype(jnp.bfloat16))
        Bst = Bst.at[l, 0, :N].set(b)

    kernel = functools.partial(_mlp_stream_kernel, num_layers=num_layers)
    return pl.pallas_call(
        kernel,
        out_shape=jax.ShapeDtypeStruct((B_pad, Dmax), out_dtype),
        grid=(B_pad // tm, num_layers),
        in_specs=[
            pl.BlockSpec((tm, Dmax), lambda i, l: (i, 0)),
            pl.BlockSpec((1, Dmax, Dmax), lambda i, l: (l, 0, 0)),
            pl.BlockSpec((1, 1, Dmax), lambda i, l: (l, 0, 0)),
        ],
        out_specs=pl.BlockSpec((tm, Dmax), lambda i, l: (i, 0)),
        scratch_shapes=[pltpu.VMEM((tm, Dmax), jnp.bfloat16)],
        compiler_params=pltpu.CompilerParams(
            dimension_semantics=("parallel", "arbitrary"),
            vmem_limit_bytes=vmem_limit),
        cost_estimate=cost,
    )(xp, W, Bst)


# ----------------------------------------------------------------------------
# Fused forward pass
# ----------------------------------------------------------------------------
def mlp_forward_fused(params, x, *, block_m=256, force_stream=None):
    """y = MLP(x) as one fused Pallas kernel.  Returns (B, out_size) float32."""
    B, In = x.shape
    num_layers = len(params)
    sizes = [In] + [w.shape[1] for w, _ in params]
    out_size = sizes[-1]
    sizes_p = [_round_up(s, LANE) for s in sizes]            # lane-dense dims
    In_pad, Out_pad, Dmax = sizes_p[0], sizes_p[-1], max(sizes_p)
    out_dtype = jnp.bfloat16
    out_isz = jnp.dtype(out_dtype).itemsize

    # Batch tile: >=16 (bf16 sublane packing); cap so the batch grid has >=2
    # steps when possible (megacore on v7x splits the "parallel" axis).
    Bp = _round_up(B, BF16_SUBLANE)
    tm = min(block_m, Bp)
    if Bp // tm < 2 and Bp >= 2 * BF16_SUBLANE:
        tm = _round_up(pl.cdiv(Bp, 2), BF16_SUBLANE)

    # Per-generation VMEM budget (v5e/v6e 128 MiB, v7x 64 MiB per TC).
    vmem_cap = _vmem_capacity_bytes()
    vmem_budget = min(int(0.6 * vmem_cap), 96 << 20)
    slack = 2 << 20

    wp_bytes = sum(kp * np_ * 2 for kp, np_ in zip(sizes_p[:-1], sizes_p[1:]))
    bp_bytes = sum(np_ * 4 for np_ in sizes_p[1:])
    np_max, kp_max = max(sizes_p[1:]), max(sizes_p[:-1])

    def resident_bytes(tm_):
        # Buffered(1) weights/biases + double-buffered in/out tiles
        # + live f32 intermediate (tm x Np_max) + live bf16 activation.
        return (wp_bytes + bp_bytes
                + 2 * tm_ * In_pad * 2 + 2 * tm_ * Out_pad * out_isz
                + tm_ * np_max * 4 + tm_ * kp_max * 2)

    def stream_bytes(tm_):
        # Double-buffered (one-layer) weight + bias + in/out tiles
        # + activation scratch + live f32 intermediate.
        return (2 * Dmax * Dmax * 2 + 2 * Dmax * 4
                + 2 * tm_ * Dmax * 2 + 2 * tm_ * Dmax * out_isz
                + tm_ * Dmax * 2 + tm_ * Dmax * 4)

    if force_stream is None:
        use_stream = resident_bytes(tm) + slack > vmem_budget
    else:
        use_stream = bool(force_stream)
    fit = stream_bytes if use_stream else resident_bytes

    # Shrink the batch tile (never below 16) until the footprint fits.
    while tm > BF16_SUBLANE and fit(tm) + slack > vmem_budget:
        tm = max(BF16_SUBLANE, _round_up(tm // 2, BF16_SUBLANE))

    B_pad = _round_up(Bp, tm)
    vmem_limit = int(min(0.9 * vmem_cap, fit(tm) + slack + (24 << 20)))

    # True (unpadded) cost: padded numbers overstate FLOPs up to 8x for the
    # narrow output layer and mis-schedule the surrounding XLA ops.
    flops = sum(2 * B * k * n for k, n in zip(sizes[:-1], sizes[1:]))
    bytes_acc = (B * In * 2
                 + sum(k * n * 2 for k, n in zip(sizes[:-1], sizes[1:]))
                 + sum(n * 4 for n in sizes[1:])
                 + B * out_size * out_isz)
    cost = pl.CostEstimate(flops=flops, transcendentals=0,
                           bytes_accessed=bytes_acc)

    if use_stream:
        out = _stream_call(params, x, B, In, tm, B_pad, Dmax,
                           out_dtype, vmem_limit, cost)
    else:
        try:
            out = _resident_call(params, x, B, In, tm, B_pad, sizes_p,
                                 out_dtype, vmem_limit, cost,
                                 single_buffer_weights=True)
        except Exception:
            # Fallback for jax versions without pl.Buffered on pallas_call
            # BlockSpecs (weights then get the default double-buffering).
            out = _resident_call(params, x, B, In, tm, B_pad, sizes_p,
                                 out_dtype, vmem_limit, cost,
                                 single_buffer_weights=False)

    return out[:B, :out_size].astype(jnp.float32)


if __name__ == "__main__":
    key = jax.random.PRNGKey(0)
    input_size, hidden_units, output_size = 32, (64, 32), 16
    batch = 8

    pkey, xkey = jax.random.split(key)
    params = init_mlp_params(pkey, input_size, hidden_units, output_size)
    x = jax.random.normal(xkey, (batch, input_size), jnp.float32)

    # Exercise both paths: all-weights-resident (default at these sizes) and
    # the weight-streaming path (used automatically for wide/deep configs).
    y_res = mlp_forward_fused(params, x, force_stream=False)
    y_str = mlp_forward_fused(params, x, force_stream=True)
    jax.block_until_ready((y_res, y_str))

    # Reference with the kernel's precision contract: bf16 operands, f32
    # accumulate + epilogue, bf16 output store.
    ref = x.astype(jnp.bfloat16)
    for i, (w, b) in enumerate(params):
        ref = jnp.dot(ref, w.astype(jnp.bfloat16),
                      preferred_element_type=jnp.float32) + b[None, :]
        if i < len(params) - 1:
            ref = jnp.maximum(ref, 0.0).astype(jnp.bfloat16)
    ref = ref.astype(jnp.bfloat16).astype(jnp.float32)

    assert y_res.shape == (batch, output_size)
    assert y_str.shape == (batch, output_size)
    assert jnp.allclose(y_res, ref, atol=2e-3, rtol=2e-3), float(
        jnp.max(jnp.abs(y_res - ref)))
    assert jnp.allclose(y_str, ref, atol=2e-3, rtol=2e-3), float(
        jnp.max(jnp.abs(y_str - ref)))
    assert jnp.allclose(y_res, y_str, atol=2e-3, rtol=2e-3)

    # Loose sanity check against the pure-f32 reference (bf16 rounding only).
    ref32 = x
    for i, (w, b) in enumerate(params):
        ref32 = ref32 @ w + b[None, :]
        if i < len(params) - 1:
            ref32 = jnp.maximum(ref32, 0.0)
    assert jnp.allclose(y_res, ref32, atol=5e-2, rtol=5e-2)

    print("KERNEL_OK")
</pallas_src>

<mosaic_0001>
module attributes {stable_mosaic.version = 11 : i64} {
  func.func @_mlp_resident_kernel(%arg0: i32, %arg1: memref<16x128xbf16, #tpu.memory_space<vmem>>, %arg2: memref<128x128xbf16, #tpu.memory_space<vmem>>, %arg3: memref<1x128xf32, #tpu.memory_space<vmem>>, %arg4: memref<128x128xbf16, #tpu.memory_space<vmem>>, %arg5: memref<1x128xf32, #tpu.memory_space<vmem>>, %arg6: memref<128x128xbf16, #tpu.memory_space<vmem>>, %arg7: memref<1x128xf32, #tpu.memory_space<vmem>>, %arg8: memref<16x128xbf16, #tpu.memory_space<vmem>>) attributes {dimension_semantics = [#tpu.dimension_semantics<parallel>], iteration_bounds = array<i64: 1>, scalar_prefetch = 0 : i64, scratch_operands = 0 : i64, tpu.core_type = #tpu.core_type<tc>, window_params = [{transform_indices = @transform_0, window_bounds = array<i64: 16, 128>}, {pipeline_mode = #tpu.pipeline_mode<synchronous>, transform_indices = @transform_1, window_bounds = array<i64: 128, 128>}, {pipeline_mode = #tpu.pipeline_mode<synchronous>, transform_indices = @transform_2, window_bounds = array<i64: 1, 128>}, {pipeline_mode = #tpu.pipeline_mode<synchronous>, transform_indices = @transform_3, window_bounds = array<i64: 128, 128>}, {pipeline_mode = #tpu.pipeline_mode<synchronous>, transform_indices = @transform_4, window_bounds = array<i64: 1, 128>}, {pipeline_mode = #tpu.pipeline_mode<synchronous>, transform_indices = @transform_5, window_bounds = array<i64: 128, 128>}, {pipeline_mode = #tpu.pipeline_mode<synchronous>, transform_indices = @transform_6, window_bounds = array<i64: 1, 128>}, {transform_indices = @transform_7, window_bounds = array<i64: 16, 128>}]} {
    %c0 = arith.constant 0 : index
    %c0_0 = arith.constant 0 : index
    %0 = vector.load %arg1[%c0, %c0_0] : memref<16x128xbf16, #tpu.memory_space<vmem>>, vector<16x128xbf16>
    %c0_1 = arith.constant 0 : index
    %c0_2 = arith.constant 0 : index
    %1 = vector.load %arg2[%c0_1, %c0_2] : memref<128x128xbf16, #tpu.memory_space<vmem>>, vector<128x128xbf16>
    %cst = arith.constant dense<0.000000e+00> : vector<16x128xf32>
    %2 = tpu.matmul %0, %1, %cst {dimension_numbers = #tpu.dot_dimension_numbers<[1], [0], [0], [1], [0, 0, 1, 1], [], []>} : vector<16x128xbf16>, vector<128x128xbf16>, vector<16x128xf32> -> vector<16x128xf32>
    %c0_3 = arith.constant 0 : index
    %c0_4 = arith.constant 0 : index
    %3 = vector.load %arg3[%c0_3, %c0_4] : memref<1x128xf32, #tpu.memory_space<vmem>>, vector<1x128xf32>
    %4 = vector.broadcast %3 : vector<1x128xf32> to vector<16x128xf32>
    %5 = arith.addf %2, %4 : vector<16x128xf32>
    %cst_5 = arith.constant 0.000000e+00 : f32
    %6 = vector.broadcast %cst_5 : f32 to vector<16x128xf32>
    %7 = arith.maximumf %5, %6 : vector<16x128xf32>
    %8 = arith.truncf %7 : vector<16x128xf32> to vector<16x128xbf16>
    %c0_6 = arith.constant 0 : index
    %c0_7 = arith.constant 0 : index
    %9 = vector.load %arg4[%c0_6, %c0_7] : memref<128x128xbf16, #tpu.memory_space<vmem>>, vector<128x128xbf16>
    %cst_8 = arith.constant dense<0.000000e+00> : vector<16x128xf32>
    %10 = tpu.matmul %8, %9, %cst_8 {dimension_numbers = #tpu.dot_dimension_numbers<[1], [0], [0], [1], [0, 0, 1, 1], [], []>} : vector<16x128xbf16>, vector<128x128xbf16>, vector<16x128xf32> -> vector<16x128xf32>
    %c0_9 = arith.constant 0 : index
    %c0_10 = arith.constant 0 : index
    %11 = vector.load %arg5[%c0_9, %c0_10] : memref<1x128xf32, #tpu.memory_space<vmem>>, vector<1x128xf32>
    %12 = vector.broadcast %11 : vector<1x128xf32> to vector<16x128xf32>
    %13 = arith.addf %10, %12 : vector<16x128xf32>
    %cst_11 = arith.constant 0.000000e+00 : f32
    %14 = vector.broadcast %cst_11 : f32 to vector<16x128xf32>
    %15 = arith.maximumf %13, %14 : vector<16x128xf32>
    %16 = arith.truncf %15 : vector<16x128xf32> to vector<16x128xbf16>
    %c0_12 = arith.constant 0 : index
    %c0_13 = arith.constant 0 : index
    %17 = vector.load %arg6[%c0_12, %c0_13] : memref<128x128xbf16, #tpu.memory_space<vmem>>, vector<128x128xbf16>
    %cst_14 = arith.constant dense<0.000000e+00> : vector<16x128xf32>
    %18 = tpu.matmul %16, %17, %cst_14 {dimension_numbers = #tpu.dot_dimension_numbers<[1], [0], [0], [1], [0, 0, 1, 1], [], []>} : vector<16x128xbf16>, vector<128x128xbf16>, vector<16x128xf32> -> vector<16x128xf32>
    %c0_15 = arith.constant 0 : index
    %c0_16 = arith.constant 0 : index
    %19 = vector.load %arg7[%c0_15, %c0_16] : memref<1x128xf32, #tpu.memory_space<vmem>>, vector<1x128xf32>
    %20 = vector.broadcast %19 : vector<1x128xf32> to vector<16x128xf32>
    %21 = arith.addf %18, %20 : vector<16x128xf32>
    %22 = arith.truncf %21 : vector<16x128xf32> to vector<16x128xbf16>
    %c0_17 = arith.constant 0 : index
    %c0_18 = arith.constant 0 : index
    %23 = vector.load %arg8[%c0_17, %c0_18] : memref<16x128xbf16, #tpu.memory_space<vmem>>, vector<16x128xbf16>
    tpu.vector_store %arg8[%c0_17, %c0_18], %22 {strides = array<i32>} : memref<16x128xbf16, #tpu.memory_space<vmem>>, vector<16x128xbf16>,
    return
  }
  func.func @transform_0(%arg0: i32) -> (i32, i32) {
    %c0_i32 = arith.constant 0 : i32
    %c0_i32_0 = arith.constant 0 : i32
    return %arg0, %c0_i32 : i32, i32
  }
  func.func @transform_1(%arg0: i32) -> (i32, i32) {
    %c0_i32 = arith.constant 0 : i32
    %c0_i32_0 = arith.constant 0 : i32
    %c0_i32_1 = arith.constant 0 : i32
    return %c0_i32, %c0_i32_0 : i32, i32
  }
  func.func @transform_2(%arg0: i32) -> (i32, i32) {
    %c0_i32 = arith.constant 0 : i32
    %c0_i32_0 = arith.constant 0 : i32
    %c0_i32_1 = arith.constant 0 : i32
    return %c0_i32, %c0_i32_0 : i32, i32
  }
  func.func @transform_3(%arg0: i32) -> (i32, i32) {
    %c0_i32 = arith.constant 0 : i32
    %c0_i32_0 = arith.constant 0 : i32
    %c0_i32_1 = arith.constant 0 : i32
    return %c0_i32, %c0_i32_0 : i32, i32
  }
  func.func @transform_4(%arg0: i32) -> (i32, i32) {
    %c0_i32 = arith.constant 0 : i32
    %c0_i32_0 = arith.constant 0 : i32
    %c0_i32_1 = arith.constant 0 : i32
    return %c0_i32, %c0_i32_0 : i32, i32
  }
  func.func @transform_5(%arg0: i32) -> (i32, i32) {
    %c0_i32 = arith.constant 0 : i32
    %c0_i32_0 = arith.constant 0 : i32
    %c0_i32_1 = arith.constant 0 : i32
    return %c0_i32, %c0_i32_0 : i32, i32
  }
  func.func @transform_6(%arg0: i32) -> (i32, i32) {
    %c0_i32 = arith.constant 0 : i32
    %c0_i32_0 = arith.constant 0 : i32
    %c0_i32_1 = arith.constant 0 : i32
    return %c0_i32, %c0_i32_0 : i32, i32
  }
  func.func @transform_7(%arg0: i32) -> (i32, i32) {
    %c0_i32 = arith.constant 0 : i32
    %c0_i32_0 = arith.constant 0 : i32
    return %arg0, %c0_i32 : i32, i32
  }
}

module attributes {stable_mosaic.version = 11 : i64} {
  func.func @_mlp_resident_kernel(%arg0: i32, %arg1: memref<16x128xbf16, #tpu.memory_space<vmem>>, %arg2: memref<128x128xbf16, #tpu.memory_space<vmem>>, %arg3: memref<1x128xf32, #tpu.memory_space<vmem>>, %arg4: memref<128x128xbf16, #tpu.memory_space<vmem>>, %arg5: memref<1x128xf32, #tpu.memory_space<vmem>>, %arg6: memref<128x128xbf16, #tpu.memory_space<vmem>>, %arg7: memref<1x128xf32, #tpu.memory_space<vmem>>, %arg8: memref<16x128xbf16, #tpu.memory_space<vmem>>) attributes {dimension_semantics = [#tpu.dimension_semantics<parallel>], iteration_bounds = array<i64: 1>, scalar_prefetch = 0 : i64, scratch_operands = 0 : i64, tpu.core_type = #tpu.core_type<tc>, window_params = [{transform_indices = @transform_0, window_bounds = array<i64: 16, 128>}, {pipeline_mode = #tpu.pipeline_mode<synchronous>, transform_indices = @transform_1, window_bounds = array<i64: 128, 128>}, {pipeline_mode = #tpu.pipeline_mode<synchronous>, transform_indices = @transform_2, window_bounds = array<i64: 1, 128>}, {pipeline_mode = #tpu.pipeline_mode<synchronous>, transform_indices = @transform_3, window_bounds = array<i64: 128, 128>}, {pipeline_mode = #tpu.pipeline_mode<synchronous>, transform_indices = @transform_4, window_bounds = array<i64: 1, 128>}, {pipeline_mode = #tpu.pipeline_mode<synchronous>, transform_indices = @transform_5, window_bounds = array<i64: 128, 128>}, {pipeline_mode = #tpu.pipeline_mode<synchronous>, transform_indices = @transform_6, window_bounds = array<i64: 1, 128>}, {transform_indices = @transform_7, window_bounds = array<i64: 16, 128>}]} {
    %c0 = arith.constant 0 : index
    %c0_0 = arith.constant 0 : index
    %0 = vector.load %arg1[%c0, %c0_0] : memref<16x128xbf16, #tpu.memory_space<vmem>>, vector<16x128xbf16>
    %c0_1 = arith.constant 0 : index
    %c0_2 = arith.constant 0 : index
    %1 = vector.load %arg2[%c0_1, %c0_2] : memref<128x128xbf16, #tpu.memory_space<vmem>>, vector<128x128xbf16>
    %cst = arith.constant dense<0.000000e+00> : vector<16x128xf32>
    %2 = tpu.matmul %0, %1, %cst {dimension_numbers = #tpu.dot_dimension_numbers<[1], [0], [0], [1], [0, 0, 1, 1], [], []>} : vector<16x128xbf16>, vector<128x128xbf16>, vector<16x128xf32> -> vector<16x128xf32>
    %c0_3 = arith.constant 0 : index
    %c0_4 = arith.constant 0 : index
    %3 = vector.load %arg3[%c0_3, %c0_4] : memref<1x128xf32, #tpu.memory_space<vmem>>, vector<1x128xf32>
    %4 = vector.broadcast %3 : vector<1x128xf32> to vector<16x128xf32>
    %5 = arith.addf %2, %4 : vector<16x128xf32>
    %cst_5 = arith.constant 0.000000e+00 : f32
    %6 = vector.broadcast %cst_5 : f32 to vector<16x128xf32>
    %7 = arith.maximumf %5, %6 : vector<16x128xf32>
    %8 = arith.truncf %7 : vector<16x128xf32> to vector<16x128xbf16>
    %c0_6 = arith.constant 0 : index
    %c0_7 = arith.constant 0 : index
    %9 = vector.load %arg4[%c0_6, %c0_7] : memref<128x128xbf16, #tpu.memory_space<vmem>>, vector<128x128xbf16>
    %cst_8 = arith.constant dense<0.000000e+00> : vector<16x128xf32>
    %10 = tpu.matmul %8, %9, %cst_8 {dimension_numbers = #tpu.dot_dimension_numbers<[1], [0], [0], [1], [0, 0, 1, 1], [], []>} : vector<16x128xbf16>, vector<128x128xbf16>, vector<16x128xf32> -> vector<16x128xf32>
    %c0_9 = arith.constant 0 : index
    %c0_10 = arith.constant 0 : index
    %11 = vector.load %arg5[%c0_9, %c0_10] : memref<1x128xf32, #tpu.memory_space<vmem>>, vector<1x128xf32>
    %12 = vector.broadcast %11 : vector<1x128xf32> to vector<16x128xf32>
    %13 = arith.addf %10, %12 : vector<16x128xf32>
    %cst_11 = arith.constant 0.000000e+00 : f32
    %14 = vector.broadcast %cst_11 : f32 to vector<16x128xf32>
    %15 = arith.maximumf %13, %14 : vector<16x128xf32>
    %16 = arith.truncf %15 : vector<16x128xf32> to vector<16x128xbf16>
    %c0_12 = arith.constant 0 : index
    %c0_13 = arith.constant 0 : index
    %17 = vector.load %arg6[%c0_12, %c0_13] : memref<128x128xbf16, #tpu.memory_space<vmem>>, vector<128x128xbf16>
    %cst_14 = arith.constant dense<0.000000e+00> : vector<16x128xf32>
    %18 = tpu.matmul %16, %17, %cst_14 {dimension_numbers = #tpu.dot_dimension_numbers<[1], [0], [0], [1], [0, 0, 1, 1], [], []>} : vector<16x128xbf16>, vector<128x128xbf16>, vector<16x128xf32> -> vector<16x128xf32>
    %c0_15 = arith.constant 0 : index
    %c0_16 = arith.constant 0 : index
    %19 = vector.load %arg7[%c0_15, %c0_16] : memref<1x128xf32, #tpu.memory_space<vmem>>, vector<1x128xf32>
    %20 = vector.broadcast %19 : vector<1x128xf32> to vector<16x128xf32>
    %21 = arith.addf %18, %20 : vector<16x128xf32>
    %22 = arith.truncf %21 : vector<16x128xf32> to vector<16x128xbf16>
    %c0_17 = arith.constant 0 : index
    %c0_18 = arith.constant 0 : index
    %23 = vector.load %arg8[%c0_17, %c0_18] : memref<16x128xbf16, #tpu.memory_space<vmem>>, vector<16x128xbf16>
    tpu.vector_store %arg8[%c0_17, %c0_18], %22 {strides = array<i32>} : memref<16x128xbf16, #tpu.memory_space<vmem>>, vector<16x128xbf16>,
    return
  }
  func.func @transform_0(%arg0: i32) -> (i32, i32) {
    %c0_i32 = arith.constant 0 : i32
    %c0_i32_0 = arith.constant 0 : i32
    return %arg0, %c0_i32 : i32, i32
  }
  func.func @transform_1(%arg0: i32) -> (i32, i32) {
    %c0_i32 = arith.constant 0 : i32
    %c0_i32_0 = arith.constant 0 : i32
    %c0_i32_1 = arith.constant 0 : i32
    return %c0_i32, %c0_i32_0 : i32, i32
  }
  func.func @transform_2(%arg0: i32) -> (i32, i32) {
    %c0_i32 = arith.constant 0 : i32
    %c0_i32_0 = arith.constant 0 : i32
    %c0_i32_1 = arith.constant 0 : i32
    return %c0_i32, %c0_i32_0 : i32, i32
  }
  func.func @transform_3(%arg0: i32) -> (i32, i32) {
    %c0_i32 = arith.constant 0 : i32
    %c0_i32_0 = arith.constant 0 : i32
    %c0_i32_1 = arith.constant 0 : i32
    return %c0_i32, %c0_i32_0 : i32, i32
  }
  func.func @transform_4(%arg0: i32) -> (i32, i32) {
    %c0_i32 = arith.constant 0 : i32
    %c0_i32_0 = arith.constant 0 : i32
    %c0_i32_1 = arith.constant 0 : i32
    return %c0_i32, %c0_i32_0 : i32, i32
  }
  func.func @transform_5(%arg0: i32) -> (i32, i32) {
    %c0_i32 = arith.constant 0 : i32
    %c0_i32_0 = arith.constant 0 : i32
    %c0_i32_1 = arith.constant 0 : i32
    return %c0_i32, %c0_i32_0 : i32, i32
  }
  func.func @transform_6(%arg0: i32) -> (i32, i32) {
    %c0_i32 = arith.constant 0 : i32
    %c0_i32_0 = arith.constant 0 : i32
    %c0_i32_1 = arith.constant 0 : i32
    return %c0_i32, %c0_i32_0 : i32, i32
  }
  func.func @transform_7(%arg0: i32) -> (i32, i32) {
    %c0_i32 = arith.constant 0 : i32
    %c0_i32_0 = arith.constant 0 : i32
    return %arg0, %c0_i32 : i32, i32
  }
}

</mosaic_0001>

<bundles_post_ra>
// kernel: tpu_custom_call.1
= control target key start
LH: loop header
LB: loop body
LE: loop exit
PB: predicated region body
PF: predicated region fallthrough
CT: control target
= control target key end

     0   :  { %12 = vsyncpa [#allocation3], 0  ;;  %s846_s0 = inlined_call_operand.hbm [shape: bf16[16,128], index: 0, kind: input, shape index: {}]   ;;  %s847_s1 = inlined_call_operand.hbm [shape: bf16[128,128], index: 1, kind: input, shape index: {}]   ;;  %s848_s2 = inlined_call_operand.vmem [shape: f32[1,128], index: 2, kind: input, shape index: {}]   ;;  %s849_s3 = inlined_call_operand.hbm [shape: bf16[128,128], index: 3, kind: input, shape index: {}]   ;;  %s850_s4 = inlined_call_operand.vmem [shape: f32[1,128], index: 4, kind: input, shape index: {}]   ;;  %s851_s5 = inlined_call_operand.hbm [shape: bf16[128,128], index: 5, kind: input, shape index: {}]   ;;  %s852_s6 = inlined_call_operand.vmem [shape: f32[1,128], index: 6, kind: input, shape index: {}]   ;;  %s853_s7 = inlined_call_operand.hbm [shape: bf16[16,128], index: 7, kind: output, shape index: {}]  }
   0x1   :  { %13 = vsyncpa [#allocation6], 0 }
   0x2   :  { %14 = vsyncpa [#allocation9], 0 }
   0x3   :  { %15 = vsyncpa [#allocation4], 0  ;;  %s728_s24 = smov [#allocation5]   ;;  %s729_s26 = smov [#allocation2]  }
   0x4   :  { %s33_s25 = sshll.u32 %s728_s24, 4  ;;  %s21_s27 = sshll.u32 %s729_s26, 4  ;;  %s34_s25 = int_to_ptr.vmem [resolvable:$true] %s33_s25  ;;  %s22_s27 = int_to_ptr.vmem [resolvable:$true] %s21_s27 }
   0x5   :  { %s628_s28 = scalar_lea.vmem %s34_s25, 1024  ;;  %p633_p1 = scmp.lt.s32.totalorder %s34_s25, %s34_s25 }
   0x6   :  { %p629_p0 = scmp.ne.s32.totalorder %s34_s25, %s628_s28  ;;  %p634_p2 = scmp.lt.s32.totalorder %s628_s28, %s628_s28 }
   0x8   :  { %p635_p3 = por %p634_p2, %p633_p1 }
   0xa   :  { %p636_p4 = pnand %p635_p3, %p629_p0 }
   0xc   :  { %639 = shalt.err (!%p636_p4)
}
   0xd   :  { %s730_s29 = smov 64   ;;  %s731_s30 = smov 4  }
   0xe   :  { %39 = dma.hbm_to_vmem [thread:$0]  %s847_s1, 1024, %s34_s25, [#allocation6], %s730_s29, %s730_s29, %s731_s30  }
   0xf   :  { %s648_s10 = scalar_lea.vmem %s22_s27, 128  ;;  %p653_p6 = scmp.lt.s32.totalorder %s22_s27, %s22_s27 }
  0x10   :  { %p649_p5 = scmp.ne.s32.totalorder %s22_s27, %s648_s10  ;;  %p654_p7 = scmp.lt.s32.totalorder %s648_s10, %s648_s10 }
  0x12   :  { %p655_p8 = por %p654_p7, %p653_p6 }
  0x14   :  { %p656_p9 = pnand %p655_p8, %p649_p5 }
  0x16   :  { %659 = shalt.err (!%p656_p9)
}
  0x17   :  { %27 = dma.hbm_to_vmem [thread:$0]  %s846_s0, 128, %s22_s27, [#allocation3], %s730_s29, %s730_s29, %s731_s30  }
  0x18   :  { %s732_s13 = smov [#allocation7]   ;;  %s733_s15 = smov [#allocation8]  }
  0x19   :  { %s47_s14 = sshll.u32 %s732_s13, 4  ;;  %s61_s16 = sshll.u32 %s733_s15, 4  ;;  %s48_s14 = int_to_ptr.vmem [resolvable:$true] %s47_s14  ;;  %s62_s16 = int_to_ptr.vmem [resolvable:$true] %s61_s16 }
  0x1a   :  { %s668_s1 = scalar_lea.vmem %s48_s14, 1024  ;;  %p673_p11 = scmp.lt.s32.totalorder %s48_s14, %s48_s14 }
  0x1b   :  { %p669_p10 = scmp.ne.s32.totalorder %s48_s14, %s668_s1  ;;  %p674_p12 = scmp.lt.s32.totalorder %s668_s1, %s668_s1 }
  0x1d   :  { %p675_p13 = por %p674_p12, %p673_p11 }
  0x1f   :  { %p676_p0 = pnand %p675_p13, %p669_p10 }
  0x21   :  { %679 = shalt.err (!%p676_p0)
}
  0x22   :  { %53 = dma.hbm_to_vmem [thread:$0]  %s849_s3, 1024, %s48_s14, [#allocation6], %s730_s29, %s730_s29, %s731_s30  }
  0x23   :  { %s688_s0 = scalar_lea.vmem %s62_s16, 1024  ;;  %p693_p2 = scmp.lt.s32.totalorder %s62_s16, %s62_s16 }
  0x24   :  { %p689_p1 = scmp.ne.s32.totalorder %s62_s16, %s688_s0  ;;  %p694_p3 = scmp.lt.s32.totalorder %s688_s0, %s688_s0 }
  0x26   :  { %p695_p4 = por %p694_p3, %p693_p2 }
  0x28   :  { %p696_p5 = pnand %p695_p4, %p689_p1 }
  0x2a   :  { %699 = shalt.err (!%p696_p5)
}
  0x2b   :  { %67 = dma.hbm_to_vmem [thread:$0]  %s851_s5, 1024, %s62_s16, [#allocation9], %s730_s29, %s730_s29, %s731_s30  }
  0x2c   :  { %720 = dma.done.wait [#allocation3], 128  }
  0x2d   :  { %721 = vsyncadd [#allocation3], 4294967168 }
  0x2e   :  { %722 = dma.done.wait [#allocation6], 2048  }
  0x2f   :  { %723 = vsyncadd [#allocation6], 4294965248 }
  0x30   :  { %724 = dma.done.wait [#allocation9], 1024  }
  0x31   :  { %725 = vsyncadd [#allocation9], 4294966272  ;;  %v734_v0 = vmov 0.0   ;;  %vm735_vm0 = vmmov 0   ;;  %v595_v1 = vld [vmem:[#allocation5 + $0x38] sm:$0xff]   ;;  %v596_v2 = vld [vmem:[#allocation5 + $0x30] sm:$0xff]  }
  0x32   :  { %526 = vmatprep.subr.bf16.mxu0 %v734_v0  ;;  %542 = vmatprep.mubr.msk.bf16.mxu0 %vm735_vm0, %v734_v0  ;;  %v597_v3 = vld [vmem:[#allocation5 + $0x28] sm:$0xff]   ;;  %v604_v4 = vld [vmem:[#allocation7 + $0x38] sm:$0xff]   ;;  %v598_v5 = vld [vmem:[#allocation5 + $0x20] sm:$0xff]   ;;  %s736_s24 = smov [#allocation10]  }
  0x33   :  { %546 = vmatprep.subr.bf16.mxu1 %v734_v0  ;;  %562 = vmatprep.mubr.msk.bf16.mxu1 %vm735_vm0, %v734_v0  ;;  %v605_v6 = vld [vmem:[#allocation7 + $0x30] sm:$0xff]   ;;  %v599_v7 = vld [vmem:[#allocation5 + $0x18] sm:$0xff]   ;;  %v606_v8 = vld [vmem:[#allocation7 + $0x28] sm:$0xff]   ;;  %s448_s25 = sshll.u32 %s736_s24, 4  ;;  %s449_s25 = int_to_ptr.vmem [resolvable:$true] %s448_s25 }
  0x34   :  { %527 = vmatpush3.bf16.msra.mxu0 %v595_v1  ;;  %547 = vmatpush3.bf16.msra.mxu1 %v604_v4  ;;  %v600_v9 = vld [vmem:[#allocation5 + $0x10] sm:$0xff]   ;;  %v607_v10 = vld [vmem:[#allocation7 + $0x20] sm:$0xff]   ;;  %v601_v11 = vld [vmem:[#allocation5 + $0x8] sm:$0xff]   ;;  %p705_p7 = scmp.lt.s32.totalorder %s449_s25, %s449_s25 }
  0x35   :  { %528 = vmatprep.subr.bf16.mxu0 %v734_v0  ;;  %548 = vmatprep.subr.bf16.mxu1 %v734_v0  ;;  %v608_v12 = vld [vmem:[#allocation7 + $0x18] sm:$0xff]   ;;  %v602_v13 = vld [vmem:[#allocation5] sm:$0xff]   ;;  %v609_v15 = vld [vmem:[#allocation7 + $0x10] sm:$0xff]  }
  0x36   :  { %v603_v14 = vld [vmem:[#allocation2] sm:$0xff]   ;;  %v610_v16 = vld [vmem:[#allocation7 + $0x8] sm:$0xff]   ;;  %v611_v17 = vld [vmem:[#allocation7] sm:$0xff]  }
  0x37   :  { %v612_v18 = vld [vmem:[#allocation8 + $0x38] sm:$0xff]   ;;  %v613_v19 = vld [vmem:[#allocation8 + $0x30] sm:$0xff]   ;;  %v614_v20 = vld [vmem:[#allocation8 + $0x28] sm:$0xff]  }
  0x38   :  { %529 = vmatpush3.bf16.msra.mxu0 %v596_v2  ;;  %549 = vmatpush3.bf16.msra.mxu1 %v605_v6  ;;  %v615_v21 = vld [vmem:[#allocation8 + $0x20] sm:$0xff]   ;;  %v616_v22 = vld [vmem:[#allocation8 + $0x18] sm:$0xff]   ;;  %v617_v33 = vld [vmem:[#allocation8 + $0x10] sm:$0xff]  }
  0x39   :  { %530 = vmatprep.subr.bf16.mxu0 %v734_v0  ;;  %550 = vmatprep.subr.bf16.mxu1 %v734_v0  ;;  %v462_v23 = vld [vmem:[%s848_s2] ss:$0 sm:$0xff]  ;;  %v618_v34 = vld [vmem:[#allocation8 + $0x8] sm:$0xff]   ;;  %v619_v35 = vld [vmem:[#allocation8] sm:$0xff]  }
  0x3a   :  { %v472_v36 = vld [vmem:[%s850_s4] ss:$0 sm:$0xff]  ;;  %s700_s4 = scalar_lea.vmem %s449_s25, 128 }
  0x3b   :  { %v481_v47 = vld [vmem:[%s852_s6] ss:$0 sm:$0xff]  ;;  %p701_p6 = scmp.ne.s32.totalorder %s449_s25, %s700_s4  ;;  %p706_p8 = scmp.lt.s32.totalorder %s700_s4, %s700_s4 }
  0x3c   :  { %531 = vmatpush3.bf16.msra.mxu0 %v597_v3  ;;  %551 = vmatpush3.bf16.msra.mxu1 %v606_v8 }
  0x3d   :  { %532 = vmatprep.subr.bf16.mxu0 %v734_v0  ;;  %552 = vmatprep.subr.bf16.mxu1 %v734_v0  ;;  %p707_p9 = por %p706_p8, %p705_p7 }
  0x3f   :  { %p708_p10 = pnand %p707_p9, %p701_p6 }
  0x40   :  { %533 = vmatpush3.bf16.msra.mxu0 %v598_v5  ;;  %553 = vmatpush3.bf16.msra.mxu1 %v607_v10 }
  0x41   :  { %534 = vmatprep.subr.bf16.mxu0 %v734_v0  ;;  %554 = vmatprep.subr.bf16.mxu1 %v734_v0 }
  0x44   :  { %535 = vmatpush3.bf16.msra.mxu0 %v599_v7  ;;  %555 = vmatpush3.bf16.msra.mxu1 %v608_v12 }
  0x45   :  { %536 = vmatprep.subr.bf16.mxu0 %v734_v0  ;;  %556 = vmatprep.subr.bf16.mxu1 %v734_v0 }
  0x48   :  { %537 = vmatpush3.bf16.msra.mxu0 %v600_v9  ;;  %557 = vmatpush3.bf16.msra.mxu1 %v609_v15 }
  0x49   :  { %538 = vmatprep.subr.bf16.mxu0 %v734_v0  ;;  %558 = vmatprep.subr.bf16.mxu1 %v734_v0 }
  0x4c   :  { %539 = vmatpush3.bf16.msra.mxu0 %v601_v11  ;;  %559 = vmatpush3.bf16.msra.mxu1 %v610_v16 }
  0x4d   :  { %540 = vmatprep.subr.bf16.mxu0 %v734_v0  ;;  %560 = vmatprep.subr.bf16.mxu1 %v734_v0 }
  0x50   :  { %541 = vmatpush3.bf16.msra.mxu0 %v602_v13  ;;  %561 = vmatpush3.bf16.msra.mxu1 %v611_v17 }
  0x51   :  { %566 = vmatprep.subr.bf16.mxu0 %v734_v0 }
  0x53   :  { %543 = vmatmul.mubr.bf16.vlgmr.msra.gmra.mxu0 %v603_v14 }
  0x54   :  { %582 = vmatprep.mubr.msk.bf16.mxu0 %vm735_vm0, %v734_v0  ;;  %567 = vmatpush3.bf16.msra.mxu0 %v612_v18 }
  0x55   :  { %568 = vmatprep.subr.bf16.mxu0 %v734_v0 }
  0x58   :  { %569 = vmatpush3.bf16.msra.mxu0 %v613_v19 }
  0x59   :  { %570 = vmatprep.subr.bf16.mxu0 %v734_v0 }
  0x5c   :  { %571 = vmatpush3.bf16.msra.mxu0 %v614_v20 }
  0x5d   :  { %572 = vmatprep.subr.bf16.mxu0 %v734_v0 }
  0x60   :  { %573 = vmatpush3.bf16.msra.mxu0 %v615_v21 }
  0x61   :  { %574 = vmatprep.subr.bf16.mxu0 %v734_v0 }
  0x64   :  { %575 = vmatpush3.bf16.msra.mxu0 %v616_v22 }
  0x65   :  { %576 = vmatprep.subr.bf16.mxu0 %v734_v0 }
  0x68   :  { %577 = vmatpush3.bf16.msra.mxu0 %v617_v33 }
  0x69   :  { %578 = vmatprep.subr.bf16.mxu0 %v734_v0 }
  0x6c   :  { %579 = vmatpush3.bf16.msra.mxu0 %v618_v34 }
  0x6d   :  { %580 = vmatprep.subr.bf16.mxu0 %v734_v0 }
  0x70   :  { %581 = vmatpush3.bf16.msra.mxu0 %v619_v35 }
 0x113   :  { %v196_v24 = vpop.f32.mrf.mxu0 }
 0x114   :  { %v197_v26 = vadd.f32 %v462_v23, %v196_v24 }
 0x115   :  { %v544_v25 = vpop.f32.mrf.mxu0 }
 0x116   :  { %v203_v30 = vmax.f32 %v197_v26, 0.0 }
 0x117   :  { %v199_v27 = vpop.f32.mrf.mxu0 }
 0x118   :  { %v200_v28 = vadd.f32 %v462_v23, %v199_v27 }
 0x119   :  { %v545_v29 = vpop.f32.mrf.mxu0 }
 0x11a   :  { %v204_v31 = vmax.f32 %v200_v28, 0.0 }
 0x11c   :  { %v205_v32 = vpack.c.bf16 %v204_v31, %v203_v30 }
 0x11e   :  { %563 = vmatmul.mubr.bf16.vlgmr.msra.gmra.mxu1 %v205_v32 }
 0x1de   :  { %v311_v37 = vpop.f32.mrf.mxu1 }
 0x1df   :  { %v312_v39 = vadd.f32 %v472_v36, %v311_v37 }
 0x1e0   :  { %v564_v38 = vpop.f32.mrf.mxu1 }
 0x1e1   :  { %v318_v43 = vmax.f32 %v312_v39, 0.0 }
 0x1e2   :  { %v314_v40 = vpop.f32.mrf.mxu1 }
 0x1e3   :  { %v315_v41 = vadd.f32 %v472_v36, %v314_v40 }
 0x1e4   :  { %v565_v42 = vpop.f32.mrf.mxu1 }
 0x1e5   :  { %v319_v44 = vmax.f32 %v315_v41, 0.0 }
 0x1e7   :  { %v320_v45 = vpack.c.bf16 %v319_v44, %v318_v43 }
 0x1e9   :  { %583 = vmatmul.mubr.bf16.vlgmr.msra.gmra.mxu0 %v320_v45 }
 0x2a9   :  { %v426_v46 = vpop.f32.mrf.mxu0 }
 0x2aa   :  { %v427_v50 = vadd.f32 %v481_v47, %v426_v46 }
 0x2ab   :  { %v584_v48 = vpop.f32.mrf.mxu0 }
 0x2ad   :  { %v429_v49 = vpop.f32.mrf.mxu0 }
 0x2ae   :  { %v430_v51 = vadd.f32 %v481_v47, %v429_v49 }
 0x2af   :  { %v585_v52 = vpop.f32.mrf.mxu0 }
 0x2b0   :  { %v497_v53 = vpack.c.bf16 %v430_v51, %v427_v50 }
 0x2b2   :  { %498 = vst [vmem:[#allocation10] sm:$0xff] %v497_v53  }
 0x2b3   :  { %711 = shalt.err (!%p708_p10)
}
 0x2b4   :  { %454 = dma.vmem_to_hbm [thread:$0]  %s449_s25, 128, %s853_s7, [#allocation4], %s730_s29, %s730_s29, %s731_s30  }
 0x2b5   :  { %726 = dma.done.wait [#allocation4], 128  }
 0x2b6   :  { %727 = vsyncadd [#allocation4], 4294967168 }
 0x2b7   :  { %458 = vsyncpa [#allocation3], 1 }
 0x2b8   :  { %459 = vsyncpa [#allocation6], 1 }
 0x2b9   :  { %460 = vsyncpa [#allocation9], 1 }
 0x2ba   :  { %461 = vsyncpa [#allocation4], 1 }

// kernel: tpu_custom_call.1
= control target key start
LH: loop header
LB: loop body
LE: loop exit
PB: predicated region body
PF: predicated region fallthrough
CT: control target
= control target key end

     0   :  { %12 = vsyncpa [#allocation3], 0  ;;  %s846_s0 = inlined_call_operand.hbm [shape: bf16[16,128], index: 0, kind: input, shape index: {}]   ;;  %s847_s1 = inlined_call_operand.hbm [shape: bf16[128,128], index: 1, kind: input, shape index: {}]   ;;  %s848_s2 = inlined_call_operand.vmem [shape: f32[1,128], index: 2, kind: input, shape index: {}]   ;;  %s849_s3 = inlined_call_operand.hbm [shape: bf16[128,128], index: 3, kind: input, shape index: {}]   ;;  %s850_s4 = inlined_call_operand.vmem [shape: f32[1,128], index: 4, kind: input, shape index: {}]   ;;  %s851_s5 = inlined_call_operand.hbm [shape: bf16[128,128], index: 5, kind: input, shape index: {}]   ;;  %s852_s6 = inlined_call_operand.vmem [shape: f32[1,128], index: 6, kind: input, shape index: {}]   ;;  %s853_s7 = inlined_call_operand.hbm [shape: bf16[16,128], index: 7, kind: output, shape index: {}]  }
   0x1   :  { %13 = vsyncpa [#allocation6], 0 }
   0x2   :  { %14 = vsyncpa [#allocation9], 0 }
   0x3   :  { %15 = vsyncpa [#allocation4], 0  ;;  %s728_s24 = smov [#allocation5]   ;;  %s729_s26 = smov [#allocation2]  }
   0x4   :  { %s33_s25 = sshll.u32 %s728_s24, 4  ;;  %s21_s27 = sshll.u32 %s729_s26, 4  ;;  %s34_s25 = int_to_ptr.vmem [resolvable:$true] %s33_s25  ;;  %s22_s27 = int_to_ptr.vmem [resolvable:$true] %s21_s27 }
   0x5   :  { %s628_s28 = scalar_lea.vmem %s34_s25, 1024  ;;  %p633_p1 = scmp.lt.s32.totalorder %s34_s25, %s34_s25 }
   0x6   :  { %p629_p0 = scmp.ne.s32.totalorder %s34_s25, %s628_s28  ;;  %p634_p2 = scmp.lt.s32.totalorder %s628_s28, %s628_s28 }
   0x8   :  { %p635_p3 = por %p634_p2, %p633_p1 }
   0xa   :  { %p636_p4 = pnand %p635_p3, %p629_p0 }
   0xc   :  { %639 = shalt.err (!%p636_p4)
}
   0xd   :  { %s730_s29 = smov 64   ;;  %s731_s30 = smov 4  }
   0xe   :  { %39 = dma.hbm_to_vmem [thread:$0]  %s847_s1, 1024, %s34_s25, [#allocation6], %s730_s29, %s730_s29, %s731_s30  }
   0xf   :  { %s648_s10 = scalar_lea.vmem %s22_s27, 128  ;;  %p653_p6 = scmp.lt.s32.totalorder %s22_s27, %s22_s27 }
  0x10   :  { %p649_p5 = scmp.ne.s32.totalorder %s22_s27, %s648_s10  ;;  %p654_p7 = scmp.lt.s32.totalorder %s648_s10, %s648_s10 }
  0x12   :  { %p655_p8 = por %p654_p7, %p653_p6 }
  0x14   :  { %p656_p9 = pnand %p655_p8, %p649_p5 }
  0x16   :  { %659 = shalt.err (!%p656_p9)
}
  0x17   :  { %27 = dma.hbm_to_vmem [thread:$0]  %s846_s0, 128, %s22_s27, [#allocation3], %s730_s29, %s730_s29, %s731_s30  }
  0x18   :  { %s732_s13 = smov [#allocation7]   ;;  %s733_s15 = smov [#allocation8]  }
  0x19   :  { %s47_s14 = sshll.u32 %s732_s13, 4  ;;  %s61_s16 = sshll.u32 %s733_s15, 4  ;;  %s48_s14 = int_to_ptr.vmem [resolvable:$true] %s47_s14  ;;  %s62_s16 = int_to_ptr.vmem [resolvable:$true] %s61_s16 }
  0x1a   :  { %s668_s1 = scalar_lea.vmem %s48_s14, 1024  ;;  %p673_p11 = scmp.lt.s32.totalorder %s48_s14, %s48_s14 }
  0x1b   :  { %p669_p10 = scmp.ne.s32.totalorder %s48_s14, %s668_s1  ;;  %p674_p12 = scmp.lt.s32.totalorder %s668_s1, %s668_s1 }
  0x1d   :  { %p675_p13 = por %p674_p12, %p673_p11 }
  0x1f   :  { %p676_p0 = pnand %p675_p13, %p669_p10 }
  0x21   :  { %679 = shalt.err (!%p676_p0)
}
  0x22   :  { %53 = dma.hbm_to_vmem [thread:$0]  %s849_s3, 1024, %s48_s14, [#allocation6], %s730_s29, %s730_s29, %s731_s30  }
  0x23   :  { %s688_s0 = scalar_lea.vmem %s62_s16, 1024  ;;  %p693_p2 = scmp.lt.s32.totalorder %s62_s16, %s62_s16 }
  0x24   :  { %p689_p1 = scmp.ne.s32.totalorder %s62_s16, %s688_s0  ;;  %p694_p3 = scmp.lt.s32.totalorder %s688_s0, %s688_s0 }
  0x26   :  { %p695_p4 = por %p694_p3, %p693_p2 }
  0x28   :  { %p696_p5 = pnand %p695_p4, %p689_p1 }
  0x2a   :  { %699 = shalt.err (!%p696_p5)
}
  0x2b   :  { %67 = dma.hbm_to_vmem [thread:$0]  %s851_s5, 1024, %s62_s16, [#allocation9], %s730_s29, %s730_s29, %s731_s30  }
  0x2c   :  { %720 = dma.done.wait [#allocation3], 128  }
  0x2d   :  { %721 = vsyncadd [#allocation3], 4294967168 }
  0x2e   :  { %722 = dma.done.wait [#allocation6], 2048  }
  0x2f   :  { %723 = vsyncadd [#allocation6], 4294965248 }
  0x30   :  { %724 = dma.done.wait [#allocation9], 1024  }
  0x31   :  { %725 = vsyncadd [#allocation9], 4294966272  ;;  %v734_v0 = vmov 0.0   ;;  %vm735_vm0 = vmmov 0   ;;  %v595_v1 = vld [vmem:[#allocation5 + $0x38] sm:$0xff]   ;;  %v596_v2 = vld [vmem:[#allocation5 + $0x30] sm:$0xff]  }
  0x32   :  { %526 = vmatprep.subr.bf16.mxu0 %v734_v0  ;;  %542 = vmatprep.mubr.msk.bf16.mxu0 %vm735_vm0, %v734_v0  ;;  %v597_v3 = vld [vmem:[#allocation5 + $0x28] sm:$0xff]   ;;  %v604_v4 = vld [vmem:[#allocation7 + $0x38] sm:$0xff]   ;;  %v598_v5 = vld [vmem:[#allocation5 + $0x20] sm:$0xff]   ;;  %s736_s24 = smov [#allocation10]  }
  0x33   :  { %546 = vmatprep.subr.bf16.mxu1 %v734_v0  ;;  %562 = vmatprep.mubr.msk.bf16.mxu1 %vm735_vm0, %v734_v0  ;;  %v605_v6 = vld [vmem:[#allocation7 + $0x30] sm:$0xff]   ;;  %v599_v7 = vld [vmem:[#allocation5 + $0x18] sm:$0xff]   ;;  %v606_v8 = vld [vmem:[#allocation7 + $0x28] sm:$0xff]   ;;  %s448_s25 = sshll.u32 %s736_s24, 4  ;;  %s449_s25 = int_to_ptr.vmem [resolvable:$true] %s448_s25 }
  0x34   :  { %527 = vmatpush3.bf16.msra.mxu0 %v595_v1  ;;  %547 = vmatpush3.bf16.msra.mxu1 %v604_v4  ;;  %v600_v9 = vld [vmem:[#allocation5 + $0x10] sm:$0xff]   ;;  %v607_v10 = vld [vmem:[#allocation7 + $0x20] sm:$0xff]   ;;  %v601_v11 = vld [vmem:[#allocation5 + $0x8] sm:$0xff]   ;;  %p705_p7 = scmp.lt.s32.totalorder %s449_s25, %s449_s25 }
  0x35   :  { %528 = vmatprep.subr.bf16.mxu0 %v734_v0  ;;  %548 = vmatprep.subr.bf16.mxu1 %v734_v0  ;;  %v608_v12 = vld [vmem:[#allocation7 + $0x18] sm:$0xff]   ;;  %v602_v13 = vld [vmem:[#allocation5] sm:$0xff]   ;;  %v609_v15 = vld [vmem:[#allocation7 + $0x10] sm:$0xff]  }
  0x36   :  { %v603_v14 = vld [vmem:[#allocation2] sm:$0xff]   ;;  %v610_v16 = vld [vmem:[#allocation7 + $0x8] sm:$0xff]   ;;  %v611_v17 = vld [vmem:[#allocation7] sm:$0xff]  }
  0x37   :  { %v612_v18 = vld [vmem:[#allocation8 + $0x38] sm:$0xff]   ;;  %v613_v19 = vld [vmem:[#allocation8 + $0x30] sm:$0xff]   ;;  %v614_v20 = vld [vmem:[#allocation8 + $0x28] sm:$0xff]  }
  0x38   :  { %529 = vmatpush3.bf16.msra.mxu0 %v596_v2  ;;  %549 = vmatpush3.bf16.msra.mxu1 %v605_v6  ;;  %v615_v21 = vld [vmem:[#allocation8 + $0x20] sm:$0xff]   ;;  %v616_v22 = vld [vmem:[#allocation8 + $0x18] sm:$0xff]   ;;  %v617_v33 = vld [vmem:[#allocation8 + $0x10] sm:$0xff]  }
  0x39   :  { %530 = vmatprep.subr.bf16.mxu0 %v734_v0  ;;  %550 = vmatprep.subr.bf16.mxu1 %v734_v0  ;;  %v462_v23 = vld [vmem:[%s848_s2] ss:$0 sm:$0xff]  ;;  %v618_v34 = vld [vmem:[#allocation8 + $0x8] sm:$0xff]   ;;  %v619_v35 = vld [vmem:[#allocation8] sm:$0xff]  }
  0x3a   :  { %v472_v36 = vld [vmem:[%s850_s4] ss:$0 sm:$0xff]  ;;  %s700_s4 = scalar_lea.vmem %s449_s25, 128 }
  0x3b   :  { %v481_v47 = vld [vmem:[%s852_s6] ss:$0 sm:$0xff]  ;;  %p701_p6 = scmp.ne.s32.totalorder %s449_s25, %s700_s4  ;;  %p706_p8 = scmp.lt.s32.totalorder %s700_s4, %s700_s4 }
  0x3c   :  { %531 = vmatpush3.bf16.msra.mxu0 %v597_v3  ;;  %551 = vmatpush3.bf16.msra.mxu1 %v606_v8 }
  0x3d   :  { %532 = vmatprep.subr.bf16.mxu0 %v734_v0  ;;  %552 = vmatprep.subr.bf16.mxu1 %v734_v0  ;;  %p707_p9 = por %p706_p8, %p705_p7 }
  0x3f   :  { %p708_p10 = pnand %p707_p9, %p701_p6 }
  0x40   :  { %533 = vmatpush3.bf16.msra.mxu0 %v598_v5  ;;  %553 = vmatpush3.bf16.msra.mxu1 %v607_v10 }
  0x41   :  { %534 = vmatprep.subr.bf16.mxu0 %v734_v0  ;;  %554 = vmatprep.subr.bf16.mxu1 %v734_v0 }
  0x44   :  { %535 = vmatpush3.bf16.msra.mxu0 %v599_v7  ;;  %555 = vmatpush3.bf16.msra.mxu1 %v608_v12 }
  0x45   :  { %536 = vmatprep.subr.bf16.mxu0 %v734_v0  ;;  %556 = vmatprep.subr.bf16.mxu1 %v734_v0 }
  0x48   :  { %537 = vmatpush3.bf16.msra.mxu0 %v600_v9  ;;  %557 = vmatpush3.bf16.msra.mxu1 %v609_v15 }
  0x49   :  { %538 = vmatprep.subr.bf16.mxu0 %v734_v0  ;;  %558 = vmatprep.subr.bf16.mxu1 %v734_v0 }
  0x4c   :  { %539 = vmatpush3.bf16.msra.mxu0 %v601_v11  ;;  %559 = vmatpush3.bf16.msra.mxu1 %v610_v16 }
  0x4d   :  { %540 = vmatprep.subr.bf16.mxu0 %v734_v0  ;;  %560 = vmatprep.subr.bf16.mxu1 %v734_v0 }
  0x50   :  { %541 = vmatpush3.bf16.msra.mxu0 %v602_v13  ;;  %561 = vmatpush3.bf16.msra.mxu1 %v611_v17 }
  0x51   :  { %566 = vmatprep.subr.bf16.mxu0 %v734_v0 }
  0x53   :  { %543 = vmatmul.mubr.bf16.vlgmr.msra.gmra.mxu0 %v603_v14 }
  0x54   :  { %582 = vmatprep.mubr.msk.bf16.mxu0 %vm735_vm0, %v734_v0  ;;  %567 = vmatpush3.bf16.msra.mxu0 %v612_v18 }
  0x55   :  { %568 = vmatprep.subr.bf16.mxu0 %v734_v0 }
  0x58   :  { %569 = vmatpush3.bf16.msra.mxu0 %v613_v19 }
  0x59   :  { %570 = vmatprep.subr.bf16.mxu0 %v734_v0 }
  0x5c   :  { %571 = vmatpush3.bf16.msra.mxu0 %v614_v20 }
  0x5d   :  { %572 = vmatprep.subr.bf16.mxu0 %v734_v0 }
  0x60   :  { %573 = vmatpush3.bf16.msra.mxu0 %v615_v21 }
  0x61   :  { %574 = vmatprep.subr.bf16.mxu0 %v734_v0 }
  0x64   :  { %575 = vmatpush3.bf16.msra.mxu0 %v616_v22 }
  0x65   :  { %576 = vmatprep.subr.bf16.mxu0 %v734_v0 }
  0x68   :  { %577 = vmatpush3.bf16.msra.mxu0 %v617_v33 }
  0x69   :  { %578 = vmatprep.subr.bf16.mxu0 %v734_v0 }
  0x6c   :  { %579 = vmatpush3.bf16.msra.mxu0 %v618_v34 }
  0x6d   :  { %580 = vmatprep.subr.bf16.mxu0 %v734_v0 }
  0x70   :  { %581 = vmatpush3.bf16.msra.mxu0 %v619_v35 }
 0x113   :  { %v196_v24 = vpop.f32.mrf.mxu0 }
 0x114   :  { %v197_v26 = vadd.f32 %v462_v23, %v196_v24 }
 0x115   :  { %v544_v25 = vpop.f32.mrf.mxu0 }
 0x116   :  { %v203_v30 = vmax.f32 %v197_v26, 0.0 }
 0x117   :  { %v199_v27 = vpop.f32.mrf.mxu0 }
 0x118   :  { %v200_v28 = vadd.f32 %v462_v23, %v199_v27 }
 0x119   :  { %v545_v29 = vpop.f32.mrf.mxu0 }
 0x11a   :  { %v204_v31 = vmax.f32 %v200_v28, 0.0 }
 0x11c   :  { %v205_v32 = vpack.c.bf16 %v204_v31, %v203_v30 }
 0x11e   :  { %563 = vmatmul.mubr.bf16.vlgmr.msra.gmra.mxu1 %v205_v32 }
 0x1de   :  { %v311_v37 = vpop.f32.mrf.mxu1 }
 0x1df   :  { %v312_v39 = vadd.f32 %v472_v36, %v311_v37 }
 0x1e0   :  { %v564_v38 = vpop.f32.mrf.mxu1 }
 0x1e1   :  { %v318_v43 = vmax.f32 %v312_v39, 0.0 }
 0x1e2   :  { %v314_v40 = vpop.f32.mrf.mxu1 }
 0x1e3   :  { %v315_v41 = vadd.f32 %v472_v36, %v314_v40 }
 0x1e4   :  { %v565_v42 = vpop.f32.mrf.mxu1 }
 0x1e5   :  { %v319_v44 = vmax.f32 %v315_v41, 0.0 }
 0x1e7   :  { %v320_v45 = vpack.c.bf16 %v319_v44, %v318_v43 }
 0x1e9   :  { %583 = vmatmul.mubr.bf16.vlgmr.msra.gmra.mxu0 %v320_v45 }
 0x2a9   :  { %v426_v46 = vpop.f32.mrf.mxu0 }
 0x2aa   :  { %v427_v50 = vadd.f32 %v481_v47, %v426_v46 }
 0x2ab   :  { %v584_v48 = vpop.f32.mrf.mxu0 }
 0x2ad   :  { %v429_v49 = vpop.f32.mrf.mxu0 }
 0x2ae   :  { %v430_v51 = vadd.f32 %v481_v47, %v429_v49 }
 0x2af   :  { %v585_v52 = vpop.f32.mrf.mxu0 }
 0x2b0   :  { %v497_v53 = vpack.c.bf16 %v430_v51, %v427_v50 }
 0x2b2   :  { %498 = vst [vmem:[#allocation10] sm:$0xff] %v497_v53  }
 0x2b3   :  { %711 = shalt.err (!%p708_p10)
}
 0x2b4   :  { %454 = dma.vmem_to_hbm [thread:$0]  %s449_s25, 128, %s853_s7, [#allocation4], %s730_s29, %s730_s29, %s731_s30  }
 0x2b5   :  { %726 = dma.done.wait [#allocation4], 128  }
 0x2b6   :  { %727 = vsyncadd [#allocation4], 4294967168 }
 0x2b7   :  { %458 = vsyncpa [#allocation3], 1 }
 0x2b8   :  { %459 = vsyncpa [#allocation6], 1 }
 0x2b9   :  { %460 = vsyncpa [#allocation9], 1 }
 0x2ba   :  { %461 = vsyncpa [#allocation4], 1 }

</bundles_post_ra>
